<compile_context>
chip_gen: v7x
topology: tpu7x:2x2x1
jax: 0.10.0
libtpu: 0.0.40
codegen_flags: <defaults>
</compile_context>

<pallas_src>
import jax
import jax.numpy as jnp
from jax.experimental import pallas as pl
from jax.experimental.pallas import tpu as pltpu


def _round_up(n, m):
    return ((n + m - 1) // m) * m


def _vmem_budget_bytes():
    """(physical VMEM capacity, usable budget) with headroom for Mosaic scratch."""
    try:
        cap = int(pltpu.get_tpu_info().vmem_capacity_bytes)
    except Exception:  # pragma: no cover - conservative fallback (v7x per-TC)
        cap = 64 << 20
    budget = max(cap - (16 << 20), 32 << 20)
    return cap, budget


def prepare_dense_params(w1, b1, w2, b2, *, compute_dtype=jnp.bfloat16):
    """Pad/cast the DenseLayer parameters once, outside the per-forward path.

    w1: (input_size, output_size)   (transposed PyTorch linear1.weight)
    b1: (output_size,) or (1, output_size)
    w2: (output_size, output_size)  (transposed PyTorch linear2.weight)
    b2: (output_size,) or (1, output_size)

    Only the output/N dims are padded (to multiples of 128 lanes); the K dim
    is left at its natural width.  Weights are cast to `compute_dtype`
    (matmul inputs); biases stay f32 (f32 accumulation / bias-add / tanh).
    """
    in_f, out_f = w1.shape
    assert w2.shape == (out_f, out_f)
    out_p = _round_up(out_f, 128)
    pad_n = out_p - out_f

    w1p = jnp.pad(w1, ((0, 0), (0, pad_n))).astype(compute_dtype)
    w2p = jnp.pad(w2, ((0, pad_n), (0, pad_n))).astype(compute_dtype)
    b1p = jnp.pad(jnp.reshape(b1, (1, -1)).astype(jnp.float32),
                  ((0, 0), (0, pad_n)))
    b2p = jnp.pad(jnp.reshape(b2, (1, -1)).astype(jnp.float32),
                  ((0, 0), (0, pad_n)))
    return (w1p, b1p, w2p, b2p, out_f)


def dense_layer_kernel(x_ref, w1_ref, b1_ref, w2_ref, b2_ref, out_ref, h_ref):
    # First N-tile of each batch tile: linear1 + tanh into the VMEM h scratch.
    @pl.when(pl.program_id(1) == 0)
    def _():
        x = x_ref[...]
        if x.dtype != w1_ref.dtype:
            x = x.astype(w1_ref.dtype)          # cheap per-tile cast (bf16 path)
        h = jnp.dot(x, w1_ref[...], preferred_element_type=jnp.float32)
        h = jnp.tanh(h + b1_ref[...])           # bias-add + tanh in f32
        h_ref[...] = h.astype(h_ref.dtype)

    # Every N-tile: one column block of linear2.
    o = jnp.dot(h_ref[...], w2_ref[...], preferred_element_type=jnp.float32)
    out_ref[...] = (o + b2_ref[...]).astype(out_ref.dtype)


def dense_layer_apply(x, params, *, tile_b=512, _force_tile_n=None):
    """Apply a prepared DenseLayer to x: (B, input_size) -> (B, output_size)."""
    w1p, b1p, w2p, b2p, out_f = params
    B, in_f = x.shape
    in_f_w, out_p = w1p.shape
    assert in_f_w == in_f and w2p.shape == (out_p, out_p)
    compute_dtype = w1p.dtype
    wbytes = jnp.dtype(compute_dtype).itemsize
    xbytes = jnp.dtype(x.dtype).itemsize

    cap, budget = _vmem_budget_bytes()

    # ---- batch tile ----
    b_rounded = _round_up(B, 8)
    tile_b = max(8, min(_round_up(tile_b, 8), b_rounded))
    # Keep >= 2 batch tiles whenever there is enough work, so v7x's two
    # TensorCores both get a share of the "parallel" batch axis.
    if b_rounded >= 16:
        tile_b = min(tile_b, _round_up(b_rounded // 2, 8))

    # ---- VMEM accounting (weights single-buffered via pl.Buffered(1)) ----
    def max_tile_b_for(tile_n):
        n_resident = (tile_n == out_p)
        w2_bufs = 1 if n_resident else 2
        fixed = (in_f * out_p * wbytes                    # w1 (resident)
                 + out_p * 4                              # b1 (resident)
                 + out_p * tile_n * wbytes * w2_bufs      # w2
                 + tile_n * 4 * w2_bufs                   # b2
                 + (2 << 20))                             # Mosaic margin
        per_row = (in_f * xbytes * 2                      # x tile (2 buffers)
                   + out_p * wbytes                       # h scratch
                   + tile_n * xbytes * 2                  # out tile (2 buffers)
                   + out_p * 4                            # f32 matmul temp (dot1)
                   + tile_n * 4)                          # f32 matmul temp (dot2)
        avail = budget - fixed
        if avail <= 0:
            return 0
        return (avail // per_row) // 8 * 8

    if _force_tile_n is not None:
        assert _force_tile_n % 128 == 0
        tile_n = _force_tile_n
    else:
        tile_n = out_p
        # Trade w2 residency for batch-tile size only when VMEM demands it.
        while tile_n > 128 and max_tile_b_for(tile_n) < min(tile_b, 256):
            tile_n = _round_up(tile_n // 2, 128)
        # TODO(synk): if w1 alone exceeds VMEM (huge input_size*output_size) a
        # hidden/K tiling with an f32 accumulator would be needed as well.
    fit_tb = max_tile_b_for(tile_n)
    if fit_tb >= 8:
        tile_b = min(tile_b, fit_tb)

    # ---- grid / batch padding (only the batch dim is ever padded here) ----
    b_p = _round_up(B, tile_b)
    xp = x if b_p == B else jnp.pad(x, ((0, b_p - B), (0, 0)))
    grid = (b_p // tile_b, pl.cdiv(out_p, tile_n))
    n_resident = grid[1] == 1

    resident = dict(pipeline_mode=pl.Buffered(1))  # DMA'd once, stays in VMEM
    if n_resident:
        w2_spec = pl.BlockSpec((out_p, tile_n), lambda i, j: (0, 0), **resident)
        b2_spec = pl.BlockSpec((1, tile_n), lambda i, j: (0, 0), **resident)
    else:
        w2_spec = pl.BlockSpec((out_p, tile_n), lambda i, j: (0, j))
        b2_spec = pl.BlockSpec((1, tile_n), lambda i, j: (0, j))

    out_padded = pl.pallas_call(
        dense_layer_kernel,
        out_shape=jax.ShapeDtypeStruct((b_p, out_p), x.dtype),
        grid=grid,
        in_specs=[
            pl.BlockSpec((tile_b, in_f), lambda i, j: (i, 0)),               # x
            pl.BlockSpec((in_f, out_p), lambda i, j: (0, 0), **resident),    # w1
            pl.BlockSpec((1, out_p), lambda i, j: (0, 0), **resident),       # b1
            w2_spec,                                                         # w2
            b2_spec,                                                         # b2
        ],
        out_specs=pl.BlockSpec((tile_b, tile_n), lambda i, j: (i, j)),
        scratch_shapes=[pltpu.VMEM((tile_b, out_p), compute_dtype)],         # h
        compiler_params=pltpu.CompilerParams(
            dimension_semantics=("parallel", "arbitrary"),
            vmem_limit_bytes=int(min(cap, budget + (8 << 20))),
        ),
    )(xp, w1p, b1p, w2p, b2p)

    return out_padded[:B, :out_f]


def dense_layer(x, w1, b1, w2, b2, *, compute_dtype=jnp.bfloat16, tile_b=512):
    """One-shot convenience wrapper (prepare + apply).

    In a real model call prepare_dense_params once at setup and reuse the
    result with dense_layer_apply so the weight pad/cast never re-runs.
    """
    params = prepare_dense_params(w1, b1, w2, b2, compute_dtype=compute_dtype)
    return dense_layer_apply(x, params, tile_b=tile_b)


def _dense_layer_ref(x, w1, b1, w2, b2):
    h = jnp.tanh(x @ w1 + jnp.reshape(b1, (1, -1)))
    return h @ w2 + jnp.reshape(b2, (1, -1))


def _make_params(key, input_size, output_size):
    kw1, kb1, kw2, kb2 = jax.random.split(key, 4)
    bound1 = 1.0 / jnp.sqrt(jnp.float32(input_size))
    bound2 = 1.0 / jnp.sqrt(jnp.float32(output_size))
    # Stored already transposed to (in, out) for the kernel's row-major matmul.
    w1 = jax.random.uniform(kw1, (input_size, output_size), jnp.float32,
                            minval=-bound1, maxval=bound1)
    b1 = jax.random.uniform(kb1, (output_size,), jnp.float32,
                            minval=-bound1, maxval=bound1)
    w2 = jax.random.uniform(kw2, (output_size, output_size), jnp.float32,
                            minval=-bound2, maxval=bound2)
    b2 = jax.random.uniform(kb2, (output_size,), jnp.float32,
                            minval=-bound2, maxval=bound2)
    return w1, b1, w2, b2


if __name__ == "__main__":
    key = jax.random.PRNGKey(0)
    k1, k2, k3, k4, k5, k6 = jax.random.split(key, 6)

    # --- Test 1: module-consistent small shapes (DenseLayer(32, 32), B=8),
    # exact-parity f32 path. ---
    B, IN, OUT = 8, 32, 32
    x = jax.random.normal(k1, (B, IN), dtype=jnp.float32)
    w1, b1, w2, b2 = _make_params(k2, IN, OUT)
    params_f32 = prepare_dense_params(w1, b1, w2, b2, compute_dtype=jnp.float32)
    out = jax.block_until_ready(dense_layer_apply(x, params_f32))
    ref = _dense_layer_ref(x, w1, b1, w2, b2)
    assert out.shape == (B, OUT)
    assert jnp.allclose(out, ref, atol=1e-5, rtol=1e-5), "f32 small-shape mismatch"

    # --- Test 2: default bf16 weights, multiple batch tiles, feature dims not
    # multiples of 128 (no K padding; only N padded). ---
    B2, IN2, OUT2 = 384, 96, 160
    x2 = jax.random.normal(k3, (B2, IN2), dtype=jnp.float32)
    w1b, b1b, w2b, b2b = _make_params(k4, IN2, OUT2)
    out2 = jax.block_until_ready(dense_layer(x2, w1b, b1b, w2b, b2b, tile_b=128))
    ref2 = _dense_layer_ref(x2, w1b, b1b, w2b, b2b)
    assert out2.shape == (B2, OUT2)
    assert jnp.allclose(out2, ref2, atol=5e-2, rtol=5e-2), "bf16 multi-tile mismatch"

    # --- Test 3: N-tiled fallback path (w2 column tiles + h scratch reuse),
    # f32 for a tight numeric check. ---
    B3, IN3, OUT3 = 64, 96, 256
    x3 = jax.random.normal(k5, (B3, IN3), dtype=jnp.float32)
    w1c, b1c, w2c, b2c = _make_params(k6, IN3, OUT3)
    params3 = prepare_dense_params(w1c, b1c, w2c, b2c, compute_dtype=jnp.float32)
    out3 = jax.block_until_ready(
        dense_layer_apply(x3, params3, tile_b=64, _force_tile_n=128))
    ref3 = _dense_layer_ref(x3, w1c, b1c, w2c, b2c)
    assert out3.shape == (B3, OUT3)
    assert jnp.allclose(out3, ref3, atol=1e-4, rtol=1e-4), "N-tiled path mismatch"

    print("KERNEL_OK")
</pallas_src>

<mosaic_0001>
module attributes {stable_mosaic.version = 11 : i64} {
  func.func @dense_layer_kernel(%arg0: i32, %arg1: i32, %arg2: memref<8x32xf32, #tpu.memory_space<vmem>>, %arg3: memref<32x128xf32, #tpu.memory_space<vmem>>, %arg4: memref<1x128xf32, #tpu.memory_space<vmem>>, %arg5: memref<128x128xf32, #tpu.memory_space<vmem>>, %arg6: memref<1x128xf32, #tpu.memory_space<vmem>>, %arg7: memref<8x128xf32, #tpu.memory_space<vmem>>, %arg8: memref<8x128xf32, #tpu.memory_space<vmem>>) attributes {dimension_semantics = [#tpu.dimension_semantics<parallel>, #tpu.dimension_semantics<arbitrary>], iteration_bounds = array<i64: 1, 1>, scalar_prefetch = 0 : i64, scratch_operands = 1 : i64, tpu.core_type = #tpu.core_type<tc>, window_params = [{transform_indices = @transform_0, window_bounds = array<i64: 8, 32>}, {pipeline_mode = #tpu.pipeline_mode<synchronous>, transform_indices = @transform_1, window_bounds = array<i64: 32, 128>}, {pipeline_mode = #tpu.pipeline_mode<synchronous>, transform_indices = @transform_2, window_bounds = array<i64: 1, 128>}, {pipeline_mode = #tpu.pipeline_mode<synchronous>, transform_indices = @transform_3, window_bounds = array<i64: 128, 128>}, {pipeline_mode = #tpu.pipeline_mode<synchronous>, transform_indices = @transform_4, window_bounds = array<i64: 1, 128>}, {transform_indices = @transform_5, window_bounds = array<i64: 8, 128>}]} {
    %c0_i32 = arith.constant 0 : i32
    %0 = arith.cmpi eq, %arg1, %c0_i32 : i32
    %1 = arith.extui %0 : i1 to i32
    %c0_i32_0 = arith.constant 0 : i32
    %2 = arith.cmpi ne, %1, %c0_i32_0 : i32
    scf.if %2 {
      %c0_8 = arith.constant 0 : index
      %c0_9 = arith.constant 0 : index
      %10 = vector.load %arg2[%c0_8, %c0_9] : memref<8x32xf32, #tpu.memory_space<vmem>>, vector<8x32xf32>
      %c0_10 = arith.constant 0 : index
      %c0_11 = arith.constant 0 : index
      %11 = vector.load %arg3[%c0_10, %c0_11] : memref<32x128xf32, #tpu.memory_space<vmem>>, vector<32x128xf32>
      %cst_12 = arith.constant dense<0.000000e+00> : vector<8x128xf32>
      %12 = tpu.matmul %10, %11, %cst_12 {dimension_numbers = #tpu.dot_dimension_numbers<[1], [0], [0], [1], [0, 0, 1, 1], [], []>} : vector<8x32xf32>, vector<32x128xf32>, vector<8x128xf32> -> vector<8x128xf32>
      %c0_13 = arith.constant 0 : index
      %c0_14 = arith.constant 0 : index
      %13 = vector.load %arg4[%c0_13, %c0_14] : memref<1x128xf32, #tpu.memory_space<vmem>>, vector<1x128xf32>
      %14 = vector.broadcast %13 : vector<1x128xf32> to vector<8x128xf32>
      %15 = arith.addf %12, %14 : vector<8x128xf32>
      %16 = math.tanh %15 : vector<8x128xf32>
      %c0_15 = arith.constant 0 : index
      %c0_16 = arith.constant 0 : index
      %17 = vector.load %arg8[%c0_15, %c0_16] : memref<8x128xf32, #tpu.memory_space<vmem>>, vector<8x128xf32>
      tpu.vector_store %arg8[%c0_15, %c0_16], %16 {strides = array<i32>} : memref<8x128xf32, #tpu.memory_space<vmem>>, vector<8x128xf32>,
    } else {
    }
    %c0 = arith.constant 0 : index
    %c0_1 = arith.constant 0 : index
    %3 = vector.load %arg8[%c0, %c0_1] : memref<8x128xf32, #tpu.memory_space<vmem>>, vector<8x128xf32>
    %c0_2 = arith.constant 0 : index
    %c0_3 = arith.constant 0 : index
    %4 = vector.load %arg5[%c0_2, %c0_3] : memref<128x128xf32, #tpu.memory_space<vmem>>, vector<128x128xf32>
    %cst = arith.constant dense<0.000000e+00> : vector<8x128xf32>
    %5 = tpu.matmul %3, %4, %cst {dimension_numbers = #tpu.dot_dimension_numbers<[1], [0], [0], [1], [0, 0, 1, 1], [], []>} : vector<8x128xf32>, vector<128x128xf32>, vector<8x128xf32> -> vector<8x128xf32>
    %c0_4 = arith.constant 0 : index
    %c0_5 = arith.constant 0 : index
    %6 = vector.load %arg6[%c0_4, %c0_5] : memref<1x128xf32, #tpu.memory_space<vmem>>, vector<1x128xf32>
    %7 = vector.broadcast %6 : vector<1x128xf32> to vector<8x128xf32>
    %8 = arith.addf %5, %7 : vector<8x128xf32>
    %c0_6 = arith.constant 0 : index
    %c0_7 = arith.constant 0 : index
    %9 = vector.load %arg7[%c0_6, %c0_7] : memref<8x128xf32, #tpu.memory_space<vmem>>, vector<8x128xf32>
    tpu.vector_store %arg7[%c0_6, %c0_7], %8 {strides = array<i32>} : memref<8x128xf32, #tpu.memory_space<vmem>>, vector<8x128xf32>,
    return
  }
  func.func @transform_0(%arg0: i32, %arg1: i32) -> (i32, i32) {
    %c0_i32 = arith.constant 0 : i32
    %c0_i32_0 = arith.constant 0 : i32
    return %arg0, %c0_i32 : i32, i32
  }
  func.func @transform_1(%arg0: i32, %arg1: i32) -> (i32, i32) {
    %c0_i32 = arith.constant 0 : i32
    %c0_i32_0 = arith.constant 0 : i32
    %c0_i32_1 = arith.constant 0 : i32
    return %c0_i32, %c0_i32_0 : i32, i32
  }
  func.func @transform_2(%arg0: i32, %arg1: i32) -> (i32, i32) {
    %c0_i32 = arith.constant 0 : i32
    %c0_i32_0 = arith.constant 0 : i32
    %c0_i32_1 = arith.constant 0 : i32
    return %c0_i32, %c0_i32_0 : i32, i32
  }
  func.func @transform_3(%arg0: i32, %arg1: i32) -> (i32, i32) {
    %c0_i32 = arith.constant 0 : i32
    %c0_i32_0 = arith.constant 0 : i32
    %c0_i32_1 = arith.constant 0 : i32
    return %c0_i32, %c0_i32_0 : i32, i32
  }
  func.func @transform_4(%arg0: i32, %arg1: i32) -> (i32, i32) {
    %c0_i32 = arith.constant 0 : i32
    %c0_i32_0 = arith.constant 0 : i32
    %c0_i32_1 = arith.constant 0 : i32
    return %c0_i32, %c0_i32_0 : i32, i32
  }
  func.func @transform_5(%arg0: i32, %arg1: i32) -> (i32, i32) {
    %c0_i32 = arith.constant 0 : i32
    return %arg0, %arg1 : i32, i32
  }
}

</mosaic_0001>

<bundles_post_ra>
// kernel: tpu_custom_call.1
= control target key start
LH: loop header
LB: loop body
LE: loop exit
PB: predicated region body
PF: predicated region fallthrough
CT: control target
= control target key end

     0   :  { %10 = vsyncpa [#allocation4], 0  ;;  %s568_s0 = inlined_call_operand.hbm [shape: f32[8,32], index: 0, kind: input, shape index: {}]   ;;  %s569_s1 = inlined_call_operand.hbm [shape: f32[32,128], index: 1, kind: input, shape index: {}]   ;;  %s570_s2 = inlined_call_operand.vmem [shape: f32[1,128], index: 2, kind: input, shape index: {}]   ;;  %s571_s3 = inlined_call_operand.hbm [shape: f32[128,128], index: 3, kind: input, shape index: {}]   ;;  %s572_s4 = inlined_call_operand.vmem [shape: f32[1,128], index: 4, kind: input, shape index: {}]   ;;  %s573_s5 = inlined_call_operand.hbm [shape: f32[8,128], index: 5, kind: output, shape index: {}]  }
   0x1   :  { %11 = vsyncpa [#allocation7], 0 }
   0x2   :  { %12 = vsyncpa [#allocation5], 0  ;;  %s469_s18 = smov [#allocation6]   ;;  %s375_s22 = scalar_lea.hbm %s569_s1, 512 }
   0x3   :  { %s28_s19 = sshll.u32 %s469_s18, 4  ;;  %p376_p0 = scmp.ne.s32.totalorder %s569_s1, %s375_s22  ;;  %s29_s19 = int_to_ptr.vmem [resolvable:$true] %s28_s19 }
   0x4   :  { %p379_p1 = scmp.lt.u32.totalorder %s375_s22, %s569_s1 }
   0x6   :  { %p381_p2 = pnand %p379_p1, %p376_p0 }
   0x8   :  { %384 = shalt.err (!%p381_p2)
}
   0x9   :  { %s385_s27 = scalar_lea.vmem %s29_s19, 512  ;;  %p390_p4 = scmp.lt.s32.totalorder %s29_s19, %s29_s19 }
   0xa   :  { %p386_p3 = scmp.ne.s32.totalorder %s29_s19, %s385_s27  ;;  %p391_p5 = scmp.lt.s32.totalorder %s385_s27, %s385_s27 }
   0xc   :  { %p392_p6 = por %p391_p5, %p390_p4 }
   0xe   :  { %p393_p7 = pnand %p392_p6, %p386_p3 }
  0x10   :  { %396 = shalt.err (!%p393_p7)
}
  0x11   :  { %s470_s28 = smov 128   ;;  %s471_s29 = smov 8  }
  0x12   :  { %34 = dma.hbm_to_vmem [thread:$0]  %s569_s1, 512, %s29_s19, [#allocation7], %s470_s28, %s470_s28, %s471_s29  }
  0x13   :  { %s472_s7 = smov [#allocation3]   ;;  %s473_s9 = smov [#allocation8]  }
  0x14   :  { %s19_s8 = sshll.u32 %s472_s7, 4  ;;  %s42_s10 = sshll.u32 %s473_s9, 4  ;;  %s20_s8 = int_to_ptr.vmem [resolvable:$true] %s19_s8  ;;  %s43_s10 = int_to_ptr.vmem [resolvable:$true] %s42_s10 }
  0x15   :  { %s397_s13 = scalar_lea.hbm %s568_s0, 128 }
  0x16   :  { %p398_p8 = scmp.ne.s32.totalorder %s568_s0, %s397_s13  ;;  %p401_p9 = scmp.lt.u32.totalorder %s397_s13, %s568_s0 }
  0x18   :  { %p403_p10 = pnand %p401_p9, %p398_p8 }
  0x1a   :  { %406 = shalt.err (!%p403_p10)
}
  0x1b   :  { %s407_s1 = scalar_lea.vmem %s20_s8, 128  ;;  %p412_p12 = scmp.lt.s32.totalorder %s20_s8, %s20_s8 }
  0x1c   :  { %p408_p11 = scmp.ne.s32.totalorder %s20_s8, %s407_s1  ;;  %p413_p13 = scmp.lt.s32.totalorder %s407_s1, %s407_s1 }
  0x1e   :  { %p414_p0 = por %p413_p13, %p412_p12 }
  0x20   :  { %p415_p1 = pnand %p414_p0, %p408_p11 }
  0x22   :  { %418 = shalt.err (!%p415_p1)
}
  0x23   :  { %22 = dma.hbm_to_vmem [thread:$0]  %s568_s0, 128, %s20_s8, [#allocation4]  }
  0x24   :  { %s419_s22 = scalar_lea.hbm %s571_s3, 2048 }
  0x25   :  { %p420_p2 = scmp.ne.s32.totalorder %s571_s3, %s419_s22  ;;  %p423_p3 = scmp.lt.u32.totalorder %s419_s22, %s571_s3 }
  0x27   :  { %p425_p4 = pnand %p423_p3, %p420_p2 }
  0x29   :  { %428 = shalt.err (!%p425_p4)
}
  0x2a   :  { %s429_s27 = scalar_lea.vmem %s43_s10, 2048  ;;  %p434_p6 = scmp.lt.s32.totalorder %s43_s10, %s43_s10 }
  0x2b   :  { %p430_p5 = scmp.ne.s32.totalorder %s43_s10, %s429_s27  ;;  %p435_p7 = scmp.lt.s32.totalorder %s429_s27, %s429_s27 }
  0x2d   :  { %p436_p8 = por %p435_p7, %p434_p6 }
  0x2f   :  { %p437_p9 = pnand %p436_p8, %p430_p5 }
  0x31   :  { %440 = shalt.err (!%p437_p9)
}
  0x32   :  { %48 = dma.hbm_to_vmem [thread:$0]  %s571_s3, 2048, %s43_s10, [#allocation7], %s470_s28, %s470_s28, %s471_s29  }
  0x33   :  { %463 = dma.done.wait [#allocation4], 128  }
  0x34   :  { %464 = vsyncadd [#allocation4], 4294967168 }
  0x35   :  { %465 = dma.done.wait [#allocation7], 2560  }
  0x36   :  { %466 = vsyncadd [#allocation7], 4294964736  ;;  %v474_v0 = vmov 0.0|0.0   ;;  %vm475_vm0 = vmmov 0   ;;  %v476_v1 = vmov 0.0   ;;  %v65_v2 = vld [vmem:[#allocation6] sm:$0xff] }
  0x37   :  { %334 = vmatprep.subr.bf16.mxu0 %v474_v0  ;;  %296 = vmatprep.mubr.msk.f32.mxu0 %vm475_vm0, %v476_v1  ;;  %v66_v3 = vld [vmem:[#allocation6 + $0x8] sm:$0xff]  ;;  %v67_v4 = vld [vmem:[#allocation6 + $0x10] sm:$0xff]  ;;  %v68_v6 = vld [vmem:[#allocation6 + $0x18] sm:$0xff]  ;;  %vm76_vm1 = vcmask 261120   ;;  %s477_s7 = smov [#allocation9]  }
  0x38   :  { %340 = vmatprep.subr.bf16.mxu1 %v474_v0  ;;  %331 = vmatprep.mubr.msk.f32.mxu1 %vm475_vm0, %v476_v1  ;;  %v335_v5 = vpack.c.bf16 %v66_v3, %v65_v2  ;;  %v153_v7 = vld [vmem:[#allocation8] sm:$0xff]  ;;  %v154_v8 = vld [vmem:[#allocation8 + $0x8] sm:$0xff]  ;;  %v155_v9 = vld [vmem:[#allocation8 + $0x10] sm:$0xff]  ;;  %v338_v11 = vpack.c.bf16 %v68_v6, %v67_v4  ;;  %s253_s8 = sshll.u32 %s477_s7, 4  ;;  %s254_s8 = int_to_ptr.vmem [resolvable:$true] %s253_s8 }
  0x39   :  { %v156_v10 = vld [vmem:[#allocation8 + $0x18] sm:$0xff]  ;;  %v341_v12 = vpack.c.bf16 %v154_v8, %v153_v7  ;;  %v157_v14 = vld [vmem:[#allocation8 + $0x20] sm:$0xff]  ;;  %v158_v15 = vld [vmem:[#allocation8 + $0x28] sm:$0xff]  ;;  %s441_s9 = scalar_lea.vmem %s254_s8, 128  ;;  %p446_p11 = scmp.lt.s32.totalorder %s254_s8, %s254_s8 }
  0x3a   :  { %336 = vmatpush3.bf16.msra.mxu0 %v335_v5  ;;  %v344_v13 = vpack.c.bf16 %v156_v10, %v155_v9  ;;  %v64_v16 = vld [vmem:[#allocation3] sm:$0xff]  ;;  %v347_v17 = vpack.c.bf16 %v158_v15, %v157_v14  ;;  %v159_v18 = vld [vmem:[#allocation8 + $0x30] sm:$0xff]  ;;  %v161_v21 = vld [vmem:[#allocation8 + $0x40] sm:$0xff]  ;;  %p442_p10 = scmp.ne.s32.totalorder %s254_s8, %s441_s9  ;;  %p447_p12 = scmp.lt.s32.totalorder %s441_s9, %s441_s9 }
  0x3b   :  { %337 = vmatprep.subr.bf16.mxu0 %v474_v0  ;;  %342 = vmatpush3.bf16.msra.mxu1 %v341_v12  ;;  %v160_v19 = vld [vmem:[#allocation8 + $0x38] sm:$0xff]  ;;  %v162_v22 = vld [vmem:[#allocation8 + $0x48] sm:$0xff]  ;;  %v163_v24 = vld [vmem:[#allocation8 + $0x50] sm:$0xff] }
  0x3c   :  { %343 = vmatprep.subr.bf16.mxu1 %v474_v0  ;;  %v350_v20 = vpack.c.bf16 %v160_v19, %v159_v18  ;;  %v353_v23 = vpack.c.bf16 %v162_v22, %v161_v21  ;;  %v164_v25 = vld [vmem:[#allocation8 + $0x58] sm:$0xff]  ;;  %v165_v27 = vld [vmem:[#allocation8 + $0x60] sm:$0xff]  ;;  %v166_v28 = vld [vmem:[#allocation8 + $0x68] sm:$0xff]  ;;  %p448_p13 = por %p447_p12, %p446_p11 }
  0x3d   :  { %v356_v26 = vpack.c.bf16 %v164_v25, %v163_v24  ;;  %v359_v29 = vpack.c.bf16 %v166_v28, %v165_v27  ;;  %v167_v30 = vld [vmem:[#allocation8 + $0x70] sm:$0xff]  ;;  %v168_v31 = vld [vmem:[#allocation8 + $0x78] sm:$0xff] }
  0x3e   :  { %339 = vmatpush3.bf16.msra.mxu0 %v338_v11  ;;  %v362_v32 = vpack.c.bf16 %v168_v31, %v167_v30  ;;  %v263_v33 = vld [vmem:[%s570_s2] ss:$0 sm:$0xff]  ;;  %p449_p0 = pnand %p448_p13, %p442_p10 }
  0x3f   :  { %345 = vmatpush3.bf16.msra.mxu1 %v344_v13  ;;  %v265_v38 = vld [vmem:[%s572_s4] ss:$0 sm:$0xff] }
  0x40   :  { %346 = vmatprep.subr.bf16.mxu1 %v474_v0 }
  0x41   :  { %297 = vmatmul.mubr.msk.f32.vlgmr.msra.gmra.mrb[0].mxu0 %vm76_vm1, %v64_v16 }
  0x43   :  { %348 = vmatpush3.bf16.msra.mxu1 %v347_v17 }
  0x44   :  { %349 = vmatprep.subr.bf16.mxu1 %v474_v0 }
  0x47   :  { %351 = vmatpush3.bf16.msra.mxu1 %v350_v20 }
  0x48   :  { %352 = vmatprep.subr.bf16.mxu1 %v474_v0 }
  0x4b   :  { %354 = vmatpush3.bf16.msra.mxu1 %v353_v23 }
  0x4c   :  { %355 = vmatprep.subr.bf16.mxu1 %v474_v0 }
  0x4f   :  { %357 = vmatpush3.bf16.msra.mxu1 %v356_v26 }
  0x50   :  { %358 = vmatprep.subr.bf16.mxu1 %v474_v0 }
  0x53   :  { %360 = vmatpush3.bf16.msra.mxu1 %v359_v29 }
  0x54   :  { %361 = vmatprep.subr.bf16.mxu1 %v474_v0 }
  0x57   :  { %363 = vmatpush3.bf16.msra.mxu1 %v362_v32 }
 0x114   :  { %v146_v34 = vpop.f32.mrb[0].mxu0 }
 0x115   :  { %v147_v35 = vadd.f32 %v263_v33, %v146_v34  ;;  %v298_v36 = vpop.f32.mrb[1].mxu0 }
 0x117   :  { %373 = vtanh.f32 %v147_v35 }
 0x121   :  { %v374_v37 = vpop.eup %373 }
 0x122   :  { %332 = vmatmul.mubr.f32.vlgmr.msra.gmra.mrb[0].mxu1 %v374_v37 }
 0x1f5   :  { %v242_v39 = vpop.f32.mrb[0].mxu1 }
 0x1f6   :  { %v243_v40 = vadd.f32 %v265_v38, %v242_v39  ;;  %v333_v41 = vpop.f32.mrb[1].mxu1 }
 0x1f8   :  { %246 = vst [vmem:[#allocation9] sm:$0xff] %v243_v40 }
 0x1f9   :  { %452 = shalt.err (!%p449_p0)
}
 0x1fa   :  { %s453_s11 = scalar_lea.hbm %s573_s5, 128 }
 0x1fb   :  { %p454_p1 = scmp.ne.s32.totalorder %s573_s5, %s453_s11  ;;  %p457_p2 = scmp.lt.u32.totalorder %s453_s11, %s573_s5 }
 0x1fd   :  { %p459_p3 = pnand %p457_p2, %p454_p1 }
 0x1ff   :  { %462 = shalt.err (!%p459_p3)
}
 0x200   :  { %256 = dma.vmem_to_hbm [thread:$0]  %s254_s8, 128, %s573_s5, [#allocation5]  }
 0x201   :  { %467 = dma.done.wait [#allocation5], 128  }
 0x202   :  { %468 = vsyncadd [#allocation5], 4294967168 }
 0x203   :  { %260 = vsyncpa [#allocation4], 1 }
 0x204   :  { %261 = vsyncpa [#allocation7], 1 }
 0x205   :  { %262 = vsyncpa [#allocation5], 1 }

</bundles_post_ra>
